<compile_context>
chip_gen: v7x
topology: tpu7x:2x2x1
jax: 0.10.0
libtpu: 0.0.40
codegen_flags: <defaults>
</compile_context>

<pallas_src>
import functools

import jax
import jax.numpy as jnp
from jax import lax
from jax.experimental import pallas as pl
from jax.experimental.pallas import tpu as pltpu


def _round_up(x, m):
    return (x + m - 1) // m * m


def _default_compute_dtype():
    """bf16 activations on v6e/v7x (bf16 VPU/EUP); f32 on v5e / older / unknown."""
    try:
        kind = jax.devices()[0].device_kind.lower()
    except Exception:
        return jnp.float32
    if any(tag in kind for tag in ("v6", "v7", "tpu7", "trillium")):
        return jnp.bfloat16
    return jnp.float32


def _choose_tiles(n, chunk, max_tile):
    """Pick (tile_n, n_pad): tile_n a multiple of chunk, n_pad a multiple of tile_n.

    Prefers >= 2 grid steps when the batch spans multiple chunks so that
    dimension_semantics=("parallel",) actually feeds both TensorCores on v7x.
    """
    n_aligned = _round_up(max(n, 1), chunk)
    n_tiles = pl.cdiv(n_aligned, max_tile)
    if n_aligned >= 2 * chunk:
        n_tiles = max(n_tiles, 2)
    tile_n = _round_up(pl.cdiv(n_aligned, n_tiles), chunk)
    n_pad = _round_up(n_aligned, tile_n)
    return tile_n, n_pad


def rawnet_kernel(x_ref, w1_ref, b1_ref, w2_ref, b2_ref, w3_ref, b3_ref, o_ref,
                  *, compute_dtype, chunk):
    # Layouts (batch on lanes):
    #   x_ref : (2, TILE_N)   w1_ref: (H, 2)   b1_ref: (H, 1)
    #   w2_ref: (H, H)        b2_ref: (H, 1)
    #   w3_ref: (H, 1)        b3_ref: (1, 1)   o_ref : (1, TILE_N)
    tile_n = x_ref.shape[1]
    n_chunks = tile_n // chunk

    # Weights/biases are tiny and VMEM-resident; load/cast once per grid step.
    w1 = w1_ref[...]                           # (H, 2) f32
    b1 = b1_ref[...]                           # (H, 1) f32
    w2 = w2_ref[...].astype(compute_dtype)     # (H, H) MXU operand
    b2 = b2_ref[...]                           # (H, 1) f32
    w3 = w3_ref[...]                           # (H, 1) f32
    b3 = b3_ref[...]                           # (1, 1) f32

    def body(c, carry):
        col = pl.multiple_of(c * chunk, chunk)
        x = x_ref[:, pl.ds(col, chunk)]        # (2, chunk) f32

        # Layer 1: Linear(2, H) + tanh.  K=2 would waste the MXU -> two VPU
        # rank-1 updates; tanh runs in compute_dtype (bf16 on v6e/v7x).
        h1 = w1[:, 0:1] * x[0:1, :] + w1[:, 1:2] * x[1:2, :] + b1
        h1 = jnp.tanh(h1.astype(compute_dtype))                 # (H, chunk)

        # Layer 2: Linear(H, H) on the MXU, f32 accumulate, tanh in compute dtype.
        h2 = jnp.dot(w2, h1, preferred_element_type=jnp.float32) + b2
        h2 = jnp.tanh(h2.astype(compute_dtype))                 # (H, chunk)

        # Layer 3: Linear(H, 1) + sigmoid.  Output width 1 -> keep it off the
        # MXU: f32 VPU multiply + sublane (XLU) reduce; lane-dense (1, chunk)
        # store into the (1, TILE_N) output tile.
        out = jnp.sum(h2.astype(jnp.float32) * w3, axis=0, keepdims=True) + b3
        o_ref[:, pl.ds(col, chunk)] = jax.nn.sigmoid(out)
        return carry

    # Partially unrolled so the LLO scheduler can overlap EUP/MXU/VPU work
    # across chunk iterations without blowing up code size for huge tiles.
    lax.fori_loop(0, n_chunks, body, 0, unroll=min(n_chunks, 8))


def rawnet_forward(x, params, *, max_tile_n=32768, chunk=512, compute_dtype=None):
    """x: (N, 2) f32.  params: PyTorch-layout weights (out, in) and biases (out,)."""
    n = x.shape[0]
    w1, b1, w2, b2, w3, b3 = (params[k] for k in ("w1", "b1", "w2", "b2", "w3", "b3"))
    h = w1.shape[0]

    if compute_dtype is None:
        compute_dtype = _default_compute_dtype()

    # Lane-chunk size must be a multiple of 128; tile cap is v7x-safe.  With
    # in-kernel chunking the VMEM per grid step is just the double-buffered
    # (2+1, tile_n) f32 I/O (~0.4 MiB at 32768) plus tiny weights, so even the
    # 32 MiB scoped limit below leaves huge headroom on every generation.
    chunk = _round_up(max(chunk, 128), 128)
    max_tile_n = _round_up(max(max_tile_n, chunk), chunk)
    tile_n, n_pad = _choose_tiles(n, chunk, max_tile_n)

    # Layout plumbing once in the wrapper: batch on lanes, pad ragged batch
    # along the lane axis only.  (Padded columns produce garbage outputs that
    # are sliced off below; any future in-kernel reduction over the batch axis
    # must mask them.)
    x_t = x.T                                           # (2, N)
    if n_pad != n:
        x_t = jnp.pad(x_t, ((0, 0), (0, n_pad - n)))
    b1_c = b1.reshape(h, 1)
    b2_c = b2.reshape(h, 1)
    w3_c = w3.T                                         # (H, 1)
    b3_c = b3.reshape(1, 1)

    const = lambda i: (0, 0)
    kernel = functools.partial(rawnet_kernel, compute_dtype=compute_dtype, chunk=chunk)
    out_t = pl.pallas_call(
        kernel,
        out_shape=jax.ShapeDtypeStruct((1, n_pad), jnp.float32),
        grid=(n_pad // tile_n,),
        in_specs=[
            pl.BlockSpec((2, tile_n), lambda i: (0, i)),   # x: tiled over batch
            pl.BlockSpec((h, 2), const),                   # weights/biases stay resident
            pl.BlockSpec((h, 1), const),
            pl.BlockSpec((h, h), const),
            pl.BlockSpec((h, 1), const),
            pl.BlockSpec((h, 1), const),
            pl.BlockSpec((1, 1), const),
        ],
        out_specs=pl.BlockSpec((1, tile_n), lambda i: (0, i)),  # lane-dense output
        compiler_params=pltpu.CompilerParams(
            dimension_semantics=("parallel",),     # shard batch grid across TCs (v7x)
            vmem_limit_bytes=32 * 1024 * 1024,     # ample on every generation
        ),
    )(x_t, w1, b1_c, w2, b2_c, w3_c, b3_c)

    return out_t[0, :n].reshape(n, 1)


def init_params(key, num_hid):
    """Deterministic init mirroring nn.Linear defaults, PyTorch (out, in) layout."""
    ks = jax.random.split(key, 6)

    def lin(kw, kb, fan_in, fan_out):
        bound = 1.0 / jnp.sqrt(jnp.float32(fan_in))
        w = jax.random.uniform(kw, (fan_out, fan_in), jnp.float32, -bound, bound)
        b = jax.random.uniform(kb, (fan_out,), jnp.float32, -bound, bound)
        return w, b

    w1, b1 = lin(ks[0], ks[1], 2, num_hid)
    w2, b2 = lin(ks[2], ks[3], num_hid, num_hid)
    w3, b3 = lin(ks[4], ks[5], num_hid, 1)
    return dict(w1=w1, b1=b1, w2=w2, b2=b2, w3=w3, b3=b3)


def rawnet_reference(x, p):
    h1 = jnp.tanh(x @ p["w1"].T + p["b1"])
    h2 = jnp.tanh(h1 @ p["w2"].T + p["b2"])
    return jax.nn.sigmoid(h2 @ p["w3"].T + p["b3"])


if __name__ == "__main__":
    key = jax.random.PRNGKey(0)
    k_x, k_p, k_x2 = jax.random.split(key, 3)

    num_hid = 32
    params = init_params(k_p, num_hid)

    compute_dtype = _default_compute_dtype()
    # bf16 activations (v6e/v7x) change numerics; loosen tolerance accordingly.
    tol = 1e-5 if compute_dtype == jnp.float32 else 2e-2

    # Small example consistent with the module spec.
    batch = 8
    x = jax.random.normal(k_x, (batch, 2), dtype=jnp.float32)
    out = rawnet_forward(x, params, compute_dtype=compute_dtype)
    jax.block_until_ready(out)
    ref = rawnet_reference(x, params)
    assert out.shape == (batch, 1)
    assert jnp.allclose(out, ref, atol=tol, rtol=tol)

    # Ragged, multi-tile batch: exercises grid >= 2 (megacore path), padding,
    # and the in-kernel lane-chunk loop.
    x_big = jax.random.normal(k_x2, (2177, 2), dtype=jnp.float32)
    out_big = rawnet_forward(x_big, params, compute_dtype=compute_dtype)
    jax.block_until_ready(out_big)
    ref_big = rawnet_reference(x_big, params)
    assert out_big.shape == (2177, 1)
    assert jnp.allclose(out_big, ref_big, atol=tol, rtol=tol)

    print("KERNEL_OK")
</pallas_src>

<mosaic_0001>
module attributes {stable_mosaic.version = 11 : i64} {
  func.func @rawnet_kernel(%arg0: i32, %arg1: memref<2x512xf32, #tpu.memory_space<vmem>>, %arg2: memref<32x2xf32, #tpu.memory_space<vmem>>, %arg3: memref<32x1xf32, #tpu.memory_space<vmem>>, %arg4: memref<32x32xf32, #tpu.memory_space<vmem>>, %arg5: memref<32x1xf32, #tpu.memory_space<vmem>>, %arg6: memref<32x1xf32, #tpu.memory_space<vmem>>, %arg7: memref<1x1xf32, #tpu.memory_space<vmem>>, %arg8: memref<1x512xf32, #tpu.memory_space<vmem>>) attributes {dimension_semantics = [#tpu.dimension_semantics<parallel>], iteration_bounds = array<i64: 1>, scalar_prefetch = 0 : i64, scratch_operands = 0 : i64, tpu.core_type = #tpu.core_type<tc>, window_params = [{transform_indices = @transform_0, window_bounds = array<i64: 2, 512>}, {pipeline_mode = #tpu.pipeline_mode<synchronous>, transform_indices = @transform_1, window_bounds = array<i64: 32, 2>}, {pipeline_mode = #tpu.pipeline_mode<synchronous>, transform_indices = @transform_2, window_bounds = array<i64: 32, 1>}, {pipeline_mode = #tpu.pipeline_mode<synchronous>, transform_indices = @transform_3, window_bounds = array<i64: 32, 32>}, {pipeline_mode = #tpu.pipeline_mode<synchronous>, transform_indices = @transform_4, window_bounds = array<i64: 32, 1>}, {pipeline_mode = #tpu.pipeline_mode<synchronous>, transform_indices = @transform_5, window_bounds = array<i64: 32, 1>}, {pipeline_mode = #tpu.pipeline_mode<synchronous>, transform_indices = @transform_6, window_bounds = array<i64: 1, 1>}, {transform_indices = @transform_7, window_bounds = array<i64: 1, 512>}]} {
    %c0 = arith.constant 0 : index
    %c0_0 = arith.constant 0 : index
    %0 = vector.load %arg2[%c0, %c0_0] : memref<32x2xf32, #tpu.memory_space<vmem>>, vector<32x2xf32>
    %c0_1 = arith.constant 0 : index
    %c0_2 = arith.constant 0 : index
    %1 = vector.load %arg3[%c0_1, %c0_2] : memref<32x1xf32, #tpu.memory_space<vmem>>, vector<32x1xf32>
    %c0_3 = arith.constant 0 : index
    %c0_4 = arith.constant 0 : index
    %2 = vector.load %arg4[%c0_3, %c0_4] : memref<32x32xf32, #tpu.memory_space<vmem>>, vector<32x32xf32>
    %c0_5 = arith.constant 0 : index
    %c0_6 = arith.constant 0 : index
    %3 = vector.load %arg5[%c0_5, %c0_6] : memref<32x1xf32, #tpu.memory_space<vmem>>, vector<32x1xf32>
    %c0_7 = arith.constant 0 : index
    %c0_8 = arith.constant 0 : index
    %4 = vector.load %arg6[%c0_7, %c0_8] : memref<32x1xf32, #tpu.memory_space<vmem>>, vector<32x1xf32>
    %c0_9 = arith.constant 0 : index
    %c0_10 = arith.constant 0 : index
    %5 = vector.load %arg7[%c0_9, %c0_10] : memref<1x1xf32, #tpu.memory_space<vmem>>, vector<1x1xf32>
    %c0_i32 = arith.constant 0 : i32
    %c512_i32 = arith.constant 512 : i32
    %6 = arith.muli %c0_i32, %c512_i32 : i32
    %7 = tpu.assume_multiple %6, 512 : i32
    %c0_11 = arith.constant 0 : index
    %8 = arith.index_cast %7 : i32 to index
    %9 = vector.load %arg1[%c0_11, %8] : memref<2x512xf32, #tpu.memory_space<vmem>>, vector<2x512xf32>
    %10 = vector.extract_strided_slice %0 {offsets = [0, 0], sizes = [32, 1], strides = [1, 1]} : vector<32x2xf32> to vector<32x1xf32>
    %11 = vector.extract_strided_slice %9 {offsets = [0, 0], sizes = [1, 512], strides = [1, 1]} : vector<2x512xf32> to vector<1x512xf32>
    %12 = vector.broadcast %10 : vector<32x1xf32> to vector<32x512xf32>
    %13 = vector.broadcast %11 : vector<1x512xf32> to vector<32x512xf32>
    %14 = arith.mulf %12, %13 : vector<32x512xf32>
    %15 = vector.extract_strided_slice %0 {offsets = [0, 1], sizes = [32, 1], strides = [1, 1]} : vector<32x2xf32> to vector<32x1xf32>
    %16 = vector.extract_strided_slice %9 {offsets = [1, 0], sizes = [1, 512], strides = [1, 1]} : vector<2x512xf32> to vector<1x512xf32>
    %17 = vector.broadcast %15 : vector<32x1xf32> to vector<32x512xf32>
    %18 = vector.broadcast %16 : vector<1x512xf32> to vector<32x512xf32>
    %19 = arith.mulf %17, %18 : vector<32x512xf32>
    %20 = arith.addf %14, %19 : vector<32x512xf32>
    %21 = vector.broadcast %1 : vector<32x1xf32> to vector<32x512xf32>
    %22 = arith.addf %20, %21 : vector<32x512xf32>
    %23 = math.tanh %22 : vector<32x512xf32>
    %cst = arith.constant dense<0.000000e+00> : vector<32x512xf32>
    %24 = tpu.matmul %2, %23, %cst {dimension_numbers = #tpu.dot_dimension_numbers<[1], [0], [0], [1], [0, 0, 1, 1], [], []>} : vector<32x32xf32>, vector<32x512xf32>, vector<32x512xf32> -> vector<32x512xf32>
    %25 = vector.broadcast %3 : vector<32x1xf32> to vector<32x512xf32>
    %26 = arith.addf %24, %25 : vector<32x512xf32>
    %27 = math.tanh %26 : vector<32x512xf32>
    %28 = vector.broadcast %4 : vector<32x1xf32> to vector<32x512xf32>
    %29 = arith.mulf %27, %28 : vector<32x512xf32>
    %cst_12 = arith.constant dense<0.000000e+00> : vector<512xf32>
    %30 = vector.multi_reduction <add>, %29, %cst_12 [0] : vector<32x512xf32> to vector<512xf32>
    %31 = vector.shape_cast %30 : vector<512xf32> to vector<1x512xf32>
    %32 = vector.broadcast %5 : vector<1x1xf32> to vector<1x512xf32>
    %33 = arith.addf %31, %32 : vector<1x512xf32>
    %34 = arith.negf %33 : vector<1x512xf32>
    %35 = math.exp %34 : vector<1x512xf32>
    %cst_13 = arith.constant 1.000000e+00 : f32
    %36 = vector.broadcast %cst_13 : f32 to vector<1x512xf32>
    %37 = arith.addf %36, %35 : vector<1x512xf32>
    %38 = arith.divf %36, %37 : vector<1x512xf32>
    %c0_14 = arith.constant 0 : index
    %39 = arith.index_cast %7 : i32 to index
    %40 = vector.load %arg8[%c0_14, %39] : memref<1x512xf32, #tpu.memory_space<vmem>>, vector<1x512xf32>
    tpu.vector_store %arg8[%c0_14, %39], %38 {strides = array<i32>} : memref<1x512xf32, #tpu.memory_space<vmem>>, vector<1x512xf32>,
    %c1_i32 = arith.constant 1 : i32
    return
  }
  func.func @transform_0(%arg0: i32) -> (i32, i32) {
    %c0_i32 = arith.constant 0 : i32
    %c0_i32_0 = arith.constant 0 : i32
    return %c0_i32, %arg0 : i32, i32
  }
  func.func @transform_1(%arg0: i32) -> (i32, i32) {
    %c0_i32 = arith.constant 0 : i32
    %c0_i32_0 = arith.constant 0 : i32
    %c0_i32_1 = arith.constant 0 : i32
    return %c0_i32, %c0_i32_0 : i32, i32
  }
  func.func @transform_2(%arg0: i32) -> (i32, i32) {
    %c0_i32 = arith.constant 0 : i32
    %c0_i32_0 = arith.constant 0 : i32
    %c0_i32_1 = arith.constant 0 : i32
    return %c0_i32, %c0_i32_0 : i32, i32
  }
  func.func @transform_3(%arg0: i32) -> (i32, i32) {
    %c0_i32 = arith.constant 0 : i32
    %c0_i32_0 = arith.constant 0 : i32
    %c0_i32_1 = arith.constant 0 : i32
    return %c0_i32, %c0_i32_0 : i32, i32
  }
  func.func @transform_4(%arg0: i32) -> (i32, i32) {
    %c0_i32 = arith.constant 0 : i32
    %c0_i32_0 = arith.constant 0 : i32
    %c0_i32_1 = arith.constant 0 : i32
    return %c0_i32, %c0_i32_0 : i32, i32
  }
  func.func @transform_5(%arg0: i32) -> (i32, i32) {
    %c0_i32 = arith.constant 0 : i32
    %c0_i32_0 = arith.constant 0 : i32
    %c0_i32_1 = arith.constant 0 : i32
    return %c0_i32, %c0_i32_0 : i32, i32
  }
  func.func @transform_6(%arg0: i32) -> (i32, i32) {
    %c0_i32 = arith.constant 0 : i32
    %c0_i32_0 = arith.constant 0 : i32
    %c0_i32_1 = arith.constant 0 : i32
    return %c0_i32, %c0_i32_0 : i32, i32
  }
  func.func @transform_7(%arg0: i32) -> (i32, i32) {
    %c0_i32 = arith.constant 0 : i32
    %c0_i32_0 = arith.constant 0 : i32
    return %c0_i32, %arg0 : i32, i32
  }
}

</mosaic_0001>

<bundles_post_ra>
// kernel: tpu_custom_call.1
= control target key start
LH: loop header
LB: loop body
LE: loop exit
PB: predicated region body
PF: predicated region fallthrough
CT: control target
= control target key end

     0   :  { %s977_s0 = inlined_call_operand.vmem [shape: f32[2,512], index: 0, kind: input, shape index: {}]   ;;  %s978_s1 = inlined_call_operand.vmem [shape: f32[32,2], index: 1, kind: input, shape index: {}]   ;;  %s979_s2 = inlined_call_operand.vmem [shape: f32[32,1], index: 2, kind: input, shape index: {}]   ;;  %s980_s3 = inlined_call_operand.vmem [shape: f32[32,32], index: 3, kind: input, shape index: {}]   ;;  %s981_s4 = inlined_call_operand.vmem [shape: f32[32,1], index: 4, kind: input, shape index: {}]   ;;  %s982_s5 = inlined_call_operand.vmem [shape: f32[32,1], index: 5, kind: input, shape index: {}]   ;;  %s983_s6 = inlined_call_operand.<no memory space> [shape: f32[1,1], index: 6, kind: input, shape index: {}]   ;;  %s984_s7 = inlined_call_operand.hbm [shape: f32[1,512], index: 7, kind: output, shape index: {}]  }
   0x1   :  { %v12_v0 = vstv %s983_s6 }
   0x2   :  { %13 = vst [vmem:[#allocation2] sm:$0x1] %v12_v0 }
   0x3   :  { %v31_v1 = vld [vmem:[%s978_s1 + $0x10] sm:$0xff]  ;;  %v29_v2 = vld [vmem:[%s978_s1] sm:$0xff]  ;;  %v787_v3 = vmov 1   ;;  %v30_v4 = vld [vmem:[%s978_s1 + $0x8] sm:$0xff]  ;;  %v788_v5 = vmov 0  }
   0x4   :  { %679 = vset.pattern.permute.xlu0 %v787_v3  ;;  %677 = vset.pattern.permute.xlu1 %v787_v3 }
   0x5   :  { %133 = vperm.xlu0 %679, %v31_v1   ;;  %125 = vperm.xlu1 %677, %v29_v2  }
   0x9   :  { %680 = vset.pattern.permute.xlu0 %v788_v5  ;;  %129 = vperm.xlu1 %677, %v30_v4  }
   0xa   :  { %14 = vsyncpa [#allocation4], 0  ;;  %53 = vperm.xlu0 %680, %v29_v2   ;;  %v32_v6 = vld [vmem:[%s978_s1 + $0x18] sm:$0xff]  ;;  %v34_v7 = vld [vmem:[%s979_s2 + $0x8] sm:$0xff]  ;;  %v789_v20 = vmov 0.0   ;;  %v72_v21 = vlaneseq  ;;  %vm280_vm0 = vcmask 261120  }
   0xb   :  { %v33_v8 = vld [vmem:[%s979_s2] sm:$0xff]  ;;  %v35_v10 = vld [vmem:[%s979_s2 + $0x10] sm:$0xff]  ;;  %v36_v12 = vld [vmem:[%s979_s2 + $0x18] sm:$0xff]  ;;  %357 = vmatprep.mubr.f32.mxu0 %v789_v20  ;;  %446 = vmatprep.mubr.f32.mxu1 %v789_v20 }
   0xc   :  { %v41_v9 = vld [vmem:[%s981_s4] sm:$0xff]  ;;  %v43_v11 = vld [vmem:[%s981_s4 + $0x10] sm:$0xff]  ;;  %v42_v14 = vld [vmem:[%s981_s4 + $0x8] sm:$0xff]  ;;  %v886_v22 = vshrl.u32 %v72_v21, 7  ;;  %vm627_vm1 = vcmp.lt.s32.totalorder %v72_v21, 512 }
   0xd   :  { %678 = vset.pattern.permute.xlu1 %v788_v5  ;;  %v45_v13 = vld [vmem:[%s982_s5] sm:$0xff]  ;;  %v47_v15 = vld [vmem:[%s982_s5 + $0x10] sm:$0xff]  ;;  %v44_v16 = vld [vmem:[%s981_s4 + $0x18] sm:$0xff] }
   0xe   :  { %58 = vperm.xlu0 %680, %v30_v4   ;;  %68 = vperm.xlu1 %678, %v32_v6   ;;  %v49_v17 = vld [vmem:[#allocation2] sm:$0x1]  ;;  %v46_v18 = vld [vmem:[%s982_s5 + $0x8] sm:$0xff]  ;;  %v48_v19 = vld [vmem:[%s982_s5 + $0x18] sm:$0xff]  ;;  %v142_v23 = vsub.s32 1, %v886_v22  ;;  %v146_v24 = vsub.s32 3, %v886_v22 }
   0xf   :  { %v50_v25 = vld [vmem:[%s977_s0] sm:$0xff]  ;;  %v150_v26 = vsub.s32 5, %v886_v22  ;;  %v154_v29 = vsub.s32 7, %v886_v22  ;;  %v896_v30 = vsub.s32 0, %v886_v22  ;;  %v78_v31 = vsub.s32 2, %v886_v22 }
  0x10   :  { %v82_v32 = vsub.s32 4, %v886_v22  ;;  %v143_v33 = vrot.slane %v50_v25, %v142_v23  ;;  %v147_v34 = vrot.slane %v50_v25, %v146_v24  ;;  %v86_v35 = vsub.s32 6, %v886_v22 }
  0x11   :  { %v151_v36 = vrot.slane %v50_v25, %v150_v26  ;;  %v155_v38 = vrot.slane %v50_v25, %v154_v29  ;;  %v75_v39 = vrot.slane %v50_v25, %v896_v30  ;;  %v79_v40 = vrot.slane %v50_v25, %v78_v31 }
  0x12   :  { %63 = vperm.xlu0 %680, %v31_v1   ;;  %681 = vset.pattern.permute.xlu1 %v787_v3  ;;  %v83_v42 = vrot.slane %v50_v25, %v82_v32  ;;  %v163_v43 = vrot.slane %v143_v33, %v142_v23  ;;  %v167_v44 = vrot.slane %v147_v34, %v142_v23 }
  0x13   :  { %137 = vperm.xlu1 %681, %v32_v6   ;;  %v87_v45 = vrot.slane %v50_v25, %v86_v35  ;;  %v902_v46 = vrot.slane %v151_v36, %v142_v23  ;;  %v904_v47 = vrot.slane %v155_v38, %v142_v23  ;;  %v95_v48 = vrot.slane %v75_v39, %v896_v30 }
  0x14   :  { %v99_v49 = vrot.slane %v79_v40, %v896_v30  ;;  %v911_v52 = vrot.slane %v83_v42, %v896_v30 }
  0x15   :  { %v914_v55 = vrot.slane %v87_v45, %v896_v30 }
  0x16   :  { %215 = vperm.xlu0 %680, %v34_v7  }
  0x17   :  { %682 = vset.pattern.permute.xlu1 %v788_v5 }
  0x18   :  { %210 = vperm.xlu1 %682, %v33_v8  }
  0x1a   :  { %262 = vperm.xlu0 %680, %v41_v9  }
  0x1c   :  { %220 = vperm.xlu1 %682, %v35_v10  }
  0x1e   :  { %272 = vperm.xlu0 %680, %v43_v11  }
  0x20   :  { %225 = vperm.xlu1 %682, %v36_v12  }
  0x22   :  { %489 = vperm.xlu0 %680, %v45_v13  }
  0x24   :  { %267 = vperm.xlu1 %682, %v42_v14  }
  0x26   :  { %499 = vperm.xlu0 %680, %v47_v15  }
  0x28   :  { %277 = vperm.xlu1 %682, %v44_v16  }
  0x2a   :  { %561 = vperm.xlu0 %680, %v49_v17  }
  0x2c   :  { %494 = vperm.xlu1 %682, %v46_v18  }
  0x30   :  { %504 = vperm.xlu1 %682, %v48_v19  }
  0x84   :  { %v126_v27 = vpop.permute.xlu1 %125  ;;  %v134_v28 = vpop.permute.xlu0 %133 }
  0x85   :  { %v176_v53 = vmul.f32 %v163_v43, %v126_v27  ;;  %v177_v54 = vmul.f32 %v167_v44, %v126_v27  ;;  %v178_v56 = vmul.f32 %v902_v46, %v126_v27  ;;  %v179_v60 = vmul.f32 %v904_v47, %v126_v27 }
  0x86   :  { %v184_v1 = vmul.f32 %v163_v43, %v134_v28  ;;  %v185_v6 = vmul.f32 %v167_v44, %v134_v28  ;;  %v186_v10 = vmul.f32 %v902_v46, %v134_v28  ;;  %v187_v14 = vmul.f32 %v904_v47, %v134_v28 }
  0x88   :  { %v130_v37 = vpop.permute.xlu1 %129 }
  0x89   :  { %v54_v41 = vpop.permute.xlu0 %53  ;;  %v180_v2 = vmul.f32 %v163_v43, %v130_v37  ;;  %v181_v3 = vmul.f32 %v167_v44, %v130_v37  ;;  %v182_v4 = vmul.f32 %v902_v46, %v130_v37  ;;  %v183_v7 = vmul.f32 %v904_v47, %v130_v37 }
  0x8a   :  { %v108_v61 = vmul.f32 %v95_v48, %v54_v41  ;;  %v109_v62 = vmul.f32 %v99_v49, %v54_v41  ;;  %v110_v8 = vmul.f32 %v911_v52, %v54_v41  ;;  %v111_v9 = vmul.f32 %v914_v55, %v54_v41 }
  0x8c   :  { %v192_v17 = vadd.f32 %v176_v53, %v108_v61  ;;  %v193_v18 = vadd.f32 %v177_v54, %v109_v62  ;;  %v194_v29 = vadd.f32 %v178_v56, %v110_v8  ;;  %v195_v31 = vadd.f32 %v179_v60, %v111_v9 }
  0x8d   :  { %v59_v50 = vpop.permute.xlu0 %58  ;;  %v908_v51 = vpop.permute.xlu1 %68 }
  0x8e   :  { %v112_v57 = vmul.f32 %v95_v48, %v59_v50  ;;  %v113_v58 = vmul.f32 %v99_v49, %v59_v50  ;;  %v114_v59 = vmul.f32 %v911_v52, %v59_v50  ;;  %v115_v63 = vmul.f32 %v914_v55, %v59_v50 }
  0x8f   :  { %v120_v33 = vmul.f32 %v95_v48, %v908_v51  ;;  %v121_v28 = vmul.f32 %v99_v49, %v908_v51 }
  0x90   :  { %v196_v11 = vadd.f32 %v180_v2, %v112_v57  ;;  %v197_v12 = vadd.f32 %v181_v3, %v113_v58  ;;  %v198_v13 = vadd.f32 %v182_v4, %v114_v59  ;;  %v199_v16 = vadd.f32 %v183_v7, %v115_v63 }
  0x91   :  { %v64_v0 = vpop.permute.xlu0 %63  ;;  %v123_v59 = vmul.f32 %v914_v55, %v908_v51 }
  0x92   :  { %v138_v5 = vpop.permute.xlu1 %137  ;;  %v116_v19 = vmul.f32 %v95_v48, %v64_v0  ;;  %v117_v26 = vmul.f32 %v99_v49, %v64_v0  ;;  %v118_v34 = vmul.f32 %v911_v52, %v64_v0  ;;  %v119_v36 = vmul.f32 %v914_v55, %v64_v0 }
  0x93   :  { %v188_v38 = vmul.f32 %v163_v43, %v138_v5  ;;  %v189_v41 = vmul.f32 %v167_v44, %v138_v5  ;;  %v190_v48 = vmul.f32 %v902_v46, %v138_v5  ;;  %v191_v49 = vmul.f32 %v904_v47, %v138_v5 }
  0x94   :  { %v200_v40 = vadd.f32 %v184_v1, %v116_v19  ;;  %v201_v45 = vadd.f32 %v185_v6, %v117_v26  ;;  %v202_v53 = vadd.f32 %v186_v10, %v118_v34  ;;  %v203_v56 = vadd.f32 %v187_v14, %v119_v36 }
  0x95   :  { %v216_v15 = vpop.permute.xlu0 %215  ;;  %v122_v43 = vmul.f32 %v911_v52, %v908_v51  ;;  %v204_v44 = vadd.f32 %v188_v38, %v120_v33  ;;  %v205_v46 = vadd.f32 %v189_v41, %v121_v28  ;;  %v207_v47 = vadd.f32 %v191_v49, %v123_v59 }
  0x96   :  { %v232_v23 = vadd.f32 %v216_v15, %v196_v11  ;;  %v233_v24 = vadd.f32 %v216_v15, %v197_v12  ;;  %v234_v25 = vadd.f32 %v216_v15, %v198_v13  ;;  %v235_v27 = vadd.f32 %v216_v15, %v199_v16 }
  0x97   :  { %v211_v32 = vpop.permute.xlu1 %210  ;;  %v206_v62 = vadd.f32 %v190_v48, %v122_v43 }
  0x98   :  { %683 = vtanh.f32 %v232_v23  ;;  %v228_v35 = vadd.f32 %v211_v32, %v192_v17  ;;  %v229_v37 = vadd.f32 %v211_v32, %v193_v18  ;;  %v230_v39 = vadd.f32 %v211_v32, %v194_v29  ;;  %v38_v29 = vld [vmem:[%s980_s3 + $0x8] sm:$0xff] }
  0x99   :  { %685 = vtanh.f32 %v233_v24  ;;  %v231_v42 = vadd.f32 %v211_v32, %v195_v31  ;;  %v39_v31 = vld [vmem:[%s980_s3 + $0x10] sm:$0xff]  ;;  %v40_v32 = vld [vmem:[%s980_s3 + $0x18] sm:$0xff]  ;;  %v263_v33 = vpop.permute.xlu0 %262 }
  0x9a   :  { %687 = vtanh.f32 %v234_v25 }
  0x9b   :  { %689 = vtanh.f32 %v235_v27  ;;  %v221_v50 = vpop.permute.xlu1 %220  ;;  %v37_v27 = vld [vmem:[%s980_s3] sm:$0xff]  ;;  %s791_s3 = smov [#allocation3]  }
  0x9c   :  { %691 = vtanh.f32 %v228_v35  ;;  %v236_v54 = vadd.f32 %v221_v50, %v200_v40  ;;  %v237_v57 = vadd.f32 %v221_v50, %v201_v45  ;;  %v238_v58 = vadd.f32 %v221_v50, %v202_v53  ;;  %s636_s15 = sshll.u32 %s791_s3, 4  ;;  %s637_s15 = int_to_ptr.vmem [resolvable:$true] %s636_s15 }
  0x9d   :  { %693 = vtanh.f32 %v229_v37  ;;  %v239_v60 = vadd.f32 %v221_v50, %v203_v56  ;;  %v273_v49 = vpop.permute.xlu0 %272  ;;  %s763_s1 = scalar_lea.vmem %s637_s15, 64  ;;  %p768_p1 = scmp.lt.s32.totalorder %s637_s15, %s637_s15 }
  0x9e   :  { %695 = vtanh.f32 %v230_v39  ;;  %p764_p0 = scmp.ne.s32.totalorder %s637_s15, %s763_s1  ;;  %p769_p2 = scmp.lt.s32.totalorder %s763_s1, %s763_s1 }
  0x9f   :  { %697 = vtanh.f32 %v231_v42  ;;  %v226_v61 = vpop.permute.xlu1 %225 }
  0xa0   :  { %699 = vtanh.f32 %v236_v54  ;;  %v240_v63 = vadd.f32 %v226_v61, %v204_v44  ;;  %v241_v0 = vadd.f32 %v226_v61, %v205_v46  ;;  %v242_v2 = vadd.f32 %v226_v61, %v206_v62  ;;  %p770_p3 = por %p769_p2, %p768_p1 }
  0xa1   :  { %701 = vtanh.f32 %v237_v57  ;;  %v243_v3 = vadd.f32 %v226_v61, %v207_v47 }
  0xa2   :  { %v684_v1 = vpop.eup %683  ;;  %703 = vtanh.f32 %v238_v58  ;;  %p771_p4 = pnand %p770_p3, %p764_p0 }
  0xa3   :  { %v686_v52 = vpop.eup %685  ;;  %705 = vtanh.f32 %v239_v60  ;;  %v268_v40 = vpop.permute.xlu1 %267 }
  0xa4   :  { %v688_v4 = vpop.eup %687  ;;  %707 = vtanh.f32 %v240_v63 }
  0xa5   :  { %v690_v5 = vpop.eup %689  ;;  %709 = vtanh.f32 %v241_v0 }
  0xa6   :  { %v692_v51 = vpop.eup %691  ;;  %711 = vtanh.f32 %v242_v2 }
  0xa7   :  { %v694_v55 = vpop.eup %693  ;;  %713 = vtanh.f32 %v243_v3  ;;  %v658_v6 = vpack.c.bf16 %v684_v1, %v692_v51  ;;  %v278_v60 = vpop.permute.xlu1 %277 }
  0xa8   :  { %v696_v7 = vpop.eup %695  ;;  %v656_v8 = vpack.c.bf16 %v686_v52, %v694_v55 }
  0xa9   :  { %v698_v9 = vpop.eup %697  ;;  %v666_v10 = vpack.c.bf16 %v688_v4, %v696_v7 }
  0xaa   :  { %v700_v11 = vpop.eup %699  ;;  %657 = vmatprep.subr.bf16.mxu0 %v656_v8  ;;  %v664_v12 = vpack.c.bf16 %v690_v5, %v698_v9  ;;  %v490_v5 = vpop.permute.xlu0 %489 }
  0xab   :  { %v702_v13 = vpop.eup %701  ;;  %659 = vmatpush1.bf16.msra.mxu0 %v658_v6  ;;  %v495_v9 = vpop.permute.xlu1 %494 }
  0xac   :  { %v704_v14 = vpop.eup %703  ;;  %665 = vmatprep.subr.bf16.mxu1 %v664_v12 }
  0xad   :  { %v706_v15 = vpop.eup %705  ;;  %667 = vmatpush1.bf16.msra.mxu1 %v666_v10 }
  0xae   :  { %v708_v16 = vpop.eup %707 }
  0xaf   :  { %v710_v17 = vpop.eup %709  ;;  %v662_v18 = vpack.c.bf16 %v708_v16, %v700_v11 }
  0xb0   :  { %v712_v19 = vpop.eup %711  ;;  %v660_v23 = vpack.c.bf16 %v710_v17, %v702_v13 }
  0xb1   :  { %v714_v24 = vpop.eup %713  ;;  %v670_v25 = vpack.c.bf16 %v712_v19, %v704_v14 }
  0xb2   :  { %661 = vmatprep.subr.bf16.mxu0 %v660_v23  ;;  %v668_v26 = vpack.c.bf16 %v714_v24, %v706_v15  ;;  %v500_v24 = vpop.permute.xlu0 %499 }
  0xb3   :  { %663 = vmatpush1.bf16.msra.mxu0 %v662_v18 }
  0xb4   :  { %669 = vmatprep.subr.bf16.mxu1 %v668_v26 }
  0xb5   :  { %671 = vmatpush1.bf16.msra.mxu1 %v670_v25 }
  0xb6   :  { %644 = vmatmul.mubr.msk.f32.vlgmr.msra.gmra.mrb[0].mxu0 %vm280_vm0, %v37_v27 }
  0xb7   :  { %363 = vmatprep.mubr.f32.mxu0 %v789_v20 }
  0xb8   :  { %648 = vmatmul.mubr.msk.f32.vlgmr.msra.gmra.mrb[0].mxu1 %vm280_vm0, %v37_v27 }
  0xb9   :  { %452 = vmatprep.mubr.f32.mxu1 %v789_v20 }
  0xba   :  { %645 = vmatmul.mubr.msk.f32.gmra.mrb[2].mxu0 %vm280_vm0, %v38_v29 }
  0xbb   :  { %369 = vmatprep.mubr.f32.mxu0 %v789_v20 }
  0xbc   :  { %649 = vmatmul.mubr.msk.f32.gmra.mrb[2].mxu1 %vm280_vm0, %v38_v29 }
  0xbd   :  { %458 = vmatprep.mubr.f32.mxu1 %v789_v20 }
  0xbe   :  { %646 = vmatmul.mubr.msk.f32.gmra.mrb[4].mxu0 %vm280_vm0, %v39_v31 }
  0xbf   :  { %375 = vmatprep.mubr.f32.mxu0 %v789_v20 }
  0xc0   :  { %650 = vmatmul.mubr.msk.f32.gmra.mrb[4].mxu1 %vm280_vm0, %v39_v31 }
  0xc1   :  { %464 = vmatprep.mubr.f32.mxu1 %v789_v20 }
  0xc2   :  { %647 = vmatmul.mubr.msk.f32.gmra.mrb[6].mxu0 %vm280_vm0, %v40_v32 }
  0xc4   :  { %651 = vmatmul.mubr.msk.f32.gmra.mrb[6].mxu1 %vm280_vm0, %v40_v32 }
 0x189   :  { %v359_v34 = vpop.f32.mrb[0].mxu0 }
 0x18a   :  { %v360_v35 = vadd.f32 %v359_v34, %v263_v33  ;;  %v361_v28 = vpop.f32.mrb[1].mxu0 }
 0x18b   :  { %v448_v36 = vpop.f32.mrb[0].mxu1  ;;  %v362_v37 = vadd.f32 %v361_v28, %v263_v33 }
 0x18c   :  { %715 = vtanh.f32 %v360_v35  ;;  %v449_v38 = vadd.f32 %v448_v36, %v263_v33  ;;  %v450_v39 = vpop.f32.mrb[1].mxu1 }
 0x18d   :  { %717 = vtanh.f32 %v362_v37  ;;  %v451_v41 = vadd.f32 %v450_v39, %v263_v33  ;;  %v365_v42 = vpop.f32.mrb[2].mxu0  ;;  %v505_v39 = vpop.permute.xlu1 %504 }
 0x18e   :  { %719 = vtanh.f32 %v449_v38  ;;  %v366_v45 = vadd.f32 %v365_v42, %v268_v40  ;;  %v367_v20 = vpop.f32.mrb[3].mxu0 }
 0x18f   :  { %721 = vtanh.f32 %v451_v41  ;;  %v454_v50 = vpop.f32.mrb[2].mxu1  ;;  %v368_v48 = vadd.f32 %v367_v20, %v268_v40 }
 0x190   :  { %723 = vtanh.f32 %v366_v45  ;;  %v455_v53 = vadd.f32 %v454_v50, %v268_v40  ;;  %v456_v54 = vpop.f32.mrb[3].mxu1 }
 0x191   :  { %725 = vtanh.f32 %v368_v48  ;;  %v457_v56 = vadd.f32 %v456_v54, %v268_v40  ;;  %v371_v57 = vpop.f32.mrb[4].mxu0 }
 0x192   :  { %727 = vtanh.f32 %v455_v53  ;;  %v372_v43 = vadd.f32 %v371_v57, %v273_v49  ;;  %v373_v58 = vpop.f32.mrb[5].mxu0 }
 0x193   :  { %729 = vtanh.f32 %v457_v56  ;;  %v460_v44 = vpop.f32.mrb[4].mxu1  ;;  %v374_v59 = vadd.f32 %v373_v58, %v273_v49 }
 0x194   :  { %731 = vtanh.f32 %v372_v43  ;;  %v461_v46 = vadd.f32 %v460_v44, %v273_v49  ;;  %v462_v61 = vpop.f32.mrb[5].mxu1 }
 0x195   :  { %733 = vtanh.f32 %v374_v59  ;;  %v463_v62 = vadd.f32 %v462_v61, %v273_v49  ;;  %v377_v63 = vpop.f32.mrb[6].mxu0 }
 0x196   :  { %v716_v47 = vpop.eup %715  ;;  %735 = vtanh.f32 %v461_v46  ;;  %v378_v0 = vadd.f32 %v377_v63, %v278_v60  ;;  %v379_v1 = vpop.f32.mrb[7].mxu0 }
 0x197   :  { %v718_v2 = vpop.eup %717  ;;  %737 = vtanh.f32 %v463_v62  ;;  %v466_v52 = vpop.f32.mrb[6].mxu1  ;;  %v380_v3 = vadd.f32 %v379_v1, %v278_v60  ;;  %v507_v11 = vmul.f32 %v716_v47, %v490_v5 }
 0x198   :  { %v720_v4 = vpop.eup %719  ;;  %739 = vtanh.f32 %v378_v0  ;;  %v467_v51 = vadd.f32 %v466_v52, %v278_v60  ;;  %v468_v55 = vpop.f32.mrb[7].mxu1  ;;  %v508_v14 = vmul.f32 %v718_v2, %v490_v5 }
 0x199   :  { %v722_v6 = vpop.eup %721  ;;  %741 = vtanh.f32 %v380_v3  ;;  %v469_v7 = vadd.f32 %v468_v55, %v278_v60  ;;  %v509_v17 = vmul.f32 %v720_v4, %v490_v5  ;;  %v562_v4 = vpop.permute.xlu0 %561 }
 0x19a   :  { %v724_v8 = vpop.eup %723  ;;  %743 = vtanh.f32 %v467_v51  ;;  %v510_v25 = vmul.f32 %v722_v6, %v490_v5 }
 0x19b   :  { %v726_v10 = vpop.eup %725  ;;  %v511_v12 = vmul.f32 %v724_v8, %v495_v9  ;;  %745 = vtanh.f32 %v469_v7 }
 0x19c   :  { %v728_v13 = vpop.eup %727  ;;  %v512_v15 = vmul.f32 %v726_v10, %v495_v9 }
 0x19d   :  { %v730_v16 = vpop.eup %729  ;;  %v523_v18 = vadd.f32 %v511_v12, %v507_v11  ;;  %v513_v19 = vmul.f32 %v728_v13, %v495_v9 }
 0x19e   :  { %v732_v23 = vpop.eup %731  ;;  %v532_v26 = vadd.f32 %v512_v15, %v508_v14  ;;  %v514_v27 = vmul.f32 %v730_v16, %v495_v9  ;;  %v567_v9 = vrot.slane %v562_v4, %v896_v30 }
 0x19f   :  { %v734_v29 = vpop.eup %733  ;;  %v541_v31 = vadd.f32 %v513_v19, %v509_v17  ;;  %v515_v32 = vmul.f32 %v732_v23, %v500_v24 }
 0x1a0   :  { %v736_v33 = vpop.eup %735  ;;  %v550_v34 = vadd.f32 %v514_v27, %v510_v25  ;;  %v516_v35 = vmul.f32 %v734_v29, %v500_v24 }
 0x1a1   :  { %v738_v28 = vpop.eup %737  ;;  %v524_v36 = vadd.f32 %v523_v18, %v515_v32  ;;  %v517_v37 = vmul.f32 %v736_v33, %v500_v24 }
 0x1a2   :  { %v740_v38 = vpop.eup %739  ;;  %v533_v40 = vadd.f32 %v532_v26, %v516_v35  ;;  %v518_v41 = vmul.f32 %v738_v28, %v500_v24  ;;  %v790_v28 = vmov 1966171168  }
 0x1a3   :  { %v742_v42 = vpop.eup %741  ;;  %v542_v45 = vadd.f32 %v541_v31, %v517_v37  ;;  %v519_v20 = vmul.f32 %v740_v38, %v505_v39 }
 0x1a4   :  { %v744_v50 = vpop.eup %743  ;;  %v551_v48 = vadd.f32 %v550_v34, %v518_v41  ;;  %v520_v53 = vmul.f32 %v742_v42, %v505_v39 }
 0x1a5   :  { %v746_v54 = vpop.eup %745  ;;  %v525_v49 = vadd.f32 %v524_v36, %v519_v20  ;;  %v521_v56 = vmul.f32 %v744_v50, %v505_v39  ;;  %v603_v36 = vunpack.c.l.s4 %v790_v28 }
 0x1a6   :  { %v534_v57 = vadd.f32 %v533_v40, %v520_v53  ;;  %v522_v43 = vmul.f32 %v746_v54, %v505_v39 }
 0x1a7   :  { %v526_v58 = vrot.slane %v525_v49, 4  ;;  %v543_v44 = vadd.f32 %v542_v45, %v521_v56  ;;  %v604_v37 = vunpack.c.0.s8 %v603_v36 }
 0x1a8   :  { %v535_v59 = vrot.slane %v534_v57, 4  ;;  %v552_v60 = vadd.f32 %v551_v48, %v522_v43 }
 0x1a9   :  { %v527_v46 = vadd.f32 %v526_v58, %v525_v49  ;;  %v544_v61 = vrot.slane %v543_v44, 4  ;;  %v607_v39 = vsub.s32 %v604_v37, %v886_v22 }
 0x1aa   :  { %v536_v62 = vadd.f32 %v535_v59, %v534_v57  ;;  %v553_v63 = vrot.slane %v552_v60, 4 }
 0x1ab   :  { %v528_v47 = vrot.slane %v527_v46, 2  ;;  %v545_v0 = vadd.f32 %v544_v61, %v543_v44 }
 0x1ac   :  { %v537_v1 = vrot.slane %v536_v62, 2  ;;  %v554_v2 = vadd.f32 %v553_v63, %v552_v60 }
 0x1ad   :  { %v529_v52 = vadd.f32 %v528_v47, %v527_v46  ;;  %v546_v3 = vrot.slane %v545_v0, 2 }
 0x1ae   :  { %v538_v5 = vadd.f32 %v537_v1, %v536_v62  ;;  %v555_v51 = vrot.slane %v554_v2, 2 }
 0x1af   :  { %v530_v55 = vrot.slane %v529_v52, 1  ;;  %v547_v6 = vadd.f32 %v546_v3, %v545_v0 }
 0x1b0   :  { %v539_v7 = vrot.slane %v538_v5, 1  ;;  %v556_v8 = vadd.f32 %v555_v51, %v554_v2 }
 0x1b1   :  { %v531_v10 = vadd.f32 %v530_v55, %v529_v52  ;;  %v548_v11 = vrot.slane %v547_v6, 1 }
 0x1b2   :  { %v540_v12 = vadd.f32 %v539_v7, %v538_v5  ;;  %v557_v13 = vrot.slane %v556_v8, 1 }
 0x1b3   :  { %v568_v14 = vadd.f32 %v567_v9, %v531_v10  ;;  %v549_v15 = vadd.f32 %v548_v11, %v547_v6 }
 0x1b4   :  { %v569_v16 = vadd.f32 %v567_v9, %v540_v12  ;;  %v558_v17 = vadd.f32 %v557_v13, %v556_v8 }
 0x1b5   :  { %v652_v18 = vmul.f32 -1.442695, %v568_v14  ;;  %v570_v19 = vadd.f32 %v567_v9, %v549_v15 }
 0x1b6   :  { %v653_v23 = vmul.f32 -1.442695, %v569_v16  ;;  %v571_v24 = vadd.f32 %v567_v9, %v558_v17 }
 0x1b7   :  { %747 = vpow2.f32 %v652_v18  ;;  %v654_v25 = vmul.f32 -1.442695, %v570_v19 }
 0x1b8   :  { %749 = vpow2.f32 %v653_v23  ;;  %v655_v26 = vmul.f32 -1.442695, %v571_v24 }
 0x1b9   :  { %751 = vpow2.f32 %v654_v25 }
 0x1ba   :  { %753 = vpow2.f32 %v655_v26 }
 0x1c1   :  { %v748_v27 = vpop.eup %747 }
 0x1c2   :  { %v750_v30 = vpop.eup %749  ;;  %v584_v29 = vadd.f32 1.0, %v748_v27 }
 0x1c3   :  { %v752_v31 = vpop.eup %751  ;;  %v585_v32 = vadd.f32 1.0, %v750_v30 }
 0x1c4   :  { %v754_v33 = vpop.eup %753  ;;  %v586_v34 = vadd.f32 1.0, %v752_v31  ;;  %755 = vrcp.f32 %v584_v29 }
 0x1c5   :  { %v587_v35 = vadd.f32 1.0, %v754_v33  ;;  %757 = vrcp.f32 %v585_v32 }
 0x1c6   :  { %759 = vrcp.f32 %v586_v34 }
 0x1c7   :  { %761 = vrcp.f32 %v587_v35 }
 0x1ce   :  { %v756_v38 = vpop.eup %755 }
 0x1cf   :  { %v758_v40 = vpop.eup %757 }
 0x1d0   :  { %v760_v41 = vpop.eup %759  ;;  %v600_v42 = vcombine.low %v756_v38, %v758_v40 }
 0x1d1   :  { %v762_v45 = vpop.eup %761 }
 0x1d2   :  { %v601_v20 = vcombine.low %v760_v41, %v762_v45  ;;  %v608_v50 = vrot.slane %v600_v42, %v607_v39 }
 0x1d4   :  { %v615_v48 = vrot.slane %v601_v20, %v607_v39 }
 0x1d6   :  { %v616_v53 = vcombine.low %v608_v50, %v615_v48 }
 0x1d8   :  { %v623_v54 = vrot.slane %v616_v53, %v607_v39 }
 0x1da   :  { %629 = vst.msk [vmem:[#allocation3] sm:$0xf] %vm627_vm1, %v623_v54 }
 0x1db   :  { %774 = shalt.err (!%p771_p4)
}
 0x1dc   :  { %s775_s18 = scalar_lea.hbm %s984_s7, 64 }
 0x1dd   :  { %p776_p5 = scmp.ne.s32.totalorder %s984_s7, %s775_s18  ;;  %p779_p6 = scmp.lt.u32.totalorder %s775_s18, %s984_s7 }
 0x1df   :  { %p781_p7 = pnand %p779_p6, %p776_p5 }
 0x1e1   :  { %784 = shalt.err (!%p781_p7)
}
 0x1e2   :  { %639 = dma.vmem_to_hbm [thread:$0]  %s637_s15, 64, %s984_s7, [#allocation4]  }
 0x1e3   :  { %785 = dma.done.wait [#allocation4], 64  }
 0x1e4   :  { %786 = vsyncadd [#allocation4], 4294967232 }
 0x1e5   :  { %643 = vsyncpa [#allocation4], 1 }

</bundles_post_ra>
